<compile_context>
chip_gen: v6e
topology: v6e:2x2x1
jax: 0.10.0
libtpu: 0.0.40
codegen_flags: <defaults>
</compile_context>

<pallas_src>
import jax
import jax.numpy as jnp
from jax import lax
from jax.experimental import pallas as pl
from jax.experimental.pallas import tpu as pltpu


def value_kernel(x_ref, wcx_ref, gamma_ref, beta_ref,
                 w1_ref, b1_ref, w2_ref, b2_ref, out_ref):
    # x_ref:   (B, C*HW) f32 VMEM   (free reshape of NCHW; channel c on lanes [c*HW,(c+1)*HW))
    # wcx_ref: (1, C*HW) f32 VMEM   pre-expanded conv weight: wcx[0, c*HW+l] = wc[c]
    # gamma/beta: (1,)   f32 SMEM   BN affine params
    # w1_ref:  (HW, 128) bf16 VMEM  ln1.weight.T (bf16 at rest)
    # b1_ref:  (1, 128)  f32 VMEM   ln1.bias
    # w2_ref:  (1, 128)  bf16 VMEM  ln2.weight (row form, bf16 at rest)
    # b2_ref:  (1,)      f32 SMEM   ln2.bias
    # out_ref: (1, B)    f32 VMEM   lane-dense output (wrapper reshapes to (B,1))
    B = x_ref.shape[0]
    HW = w1_ref.shape[0]
    C = x_ref.shape[1] // HW

    # ---- 1x1 conv over channels -------------------------------------------
    # Single vectorized multiply (conv weight broadcast once from VMEM), then
    # the channel reduction as C-1 adds of static, 128-aligned lane slabs.
    # Conv bias is omitted: a constant shift is exactly cancelled by the
    # training-mode BN mean subtraction below (mathematically identical).
    xw = x_ref[...] * wcx_ref[...]                   # (B, C*HW) f32, VPU
    y = xw[:, 0:HW]
    for c in range(1, C):                            # static, tiny unroll
        y = y + xw[:, c * HW:(c + 1) * HW]           # (B, HW) f32

    # ---- BatchNorm2d(1), training-mode batch stats, fused scale/shift ------
    # One traversal for both moments; f32 accumulation.  Inputs are conv
    # outputs (roughly zero-mean), so the one-pass variance is well behaved.
    n = float(B * HW)
    s1 = jnp.sum(y)
    s2 = jnp.sum(y * y)
    mean = s1 / n
    var = jnp.maximum(s2 / n - mean * mean, 0.0)     # biased variance
    scale = gamma_ref[0] * lax.rsqrt(var + 1e-5)
    shift = beta_ref[0] - mean * scale
    y = jnp.maximum(y * scale + shift, 0.0)          # BN + ReLU fused, f32

    # ---- ln1 (+ ReLU): MXU, bf16 operands, f32 accumulation -----------------
    h = jnp.dot(y.astype(jnp.bfloat16), w1_ref[...],
                preferred_element_type=jnp.float32) + b1_ref[...]
    h = jnp.maximum(h, 0.0)                          # (B, 128) f32

    # ---- ln2 (+ Tanh), lane-dense (1, B) output -----------------------------
    # Contract the hidden axis of w2 (1,128) against h (B,128) -> (1, B):
    # same trans-B contraction pattern as attention's q @ k^T, so the result
    # is already lane-dense and needs no sublane->lane relayout or masked
    # last-dim-1 stores.
    o = jnp.einsum('od,bd->ob', w2_ref[...], h.astype(jnp.bfloat16),
                   preferred_element_type=jnp.float32)      # (1, B) f32
    out_ref[...] = jnp.tanh(o + b2_ref[0])


def value_forward(x_nchw, params):
    """x_nchw: (B, C, H, W) float32. Returns (B, 1) float32."""
    B, C, H, W = x_nchw.shape
    HW = H * W

    # Free (bitcast) reshape: NCHW -> (B, C*H*W). No transpose, no extra HBM pass.
    x2 = x_nchw.reshape(B, C * HW).astype(jnp.float32)

    vmem = pl.BlockSpec(memory_space=pltpu.MemorySpace.VMEM)
    smem = pl.BlockSpec(memory_space=pltpu.MemorySpace.SMEM)

    out_1b = pl.pallas_call(
        value_kernel,
        out_shape=jax.ShapeDtypeStruct((1, B), jnp.float32),
        in_specs=[vmem, vmem, smem, smem, vmem, vmem, vmem, smem],
        out_specs=vmem,
    )(x2, params["wcx"], params["gamma"], params["beta"],
      params["w1t"], params["b1"], params["w2r"], params["b2"])

    return out_1b.reshape(B, 1)   # (1,B) -> (B,1) is a free bitcast


def value_forward_ref(x, params, *, bf16_matmul=True):
    """Pure-JAX reference. bf16_matmul=True mirrors the kernel's MXU dtype policy."""
    B, C, H, W = x.shape
    wc, bc = params["wc"], params["bc"]
    gamma, beta = params["gamma"], params["beta"]
    w1t, b1, w2r, b2 = params["w1t"], params["b1"], params["w2r"], params["b2"]

    y = jnp.einsum('bchw,c->bhw', x, wc) + bc[0]          # conv (bias included here;
    mean = jnp.mean(y)                                    #  it cancels under BN)
    var = jnp.mean((y - mean) ** 2)                       # biased var, training mode
    y = (y - mean) * lax.rsqrt(var + 1e-5) * gamma[0] + beta[0]
    y = jnp.maximum(y, 0.0).reshape(B, H * W)

    if bf16_matmul:
        h = jnp.dot(y.astype(jnp.bfloat16), w1t.astype(jnp.bfloat16),
                    preferred_element_type=jnp.float32) + b1
        h = jnp.maximum(h, 0.0)
        o = jnp.dot(h.astype(jnp.bfloat16), w2r.astype(jnp.bfloat16).T,
                    preferred_element_type=jnp.float32) + b2[0]
    else:
        h = jnp.dot(y, w1t.astype(jnp.float32),
                    preferred_element_type=jnp.float32,
                    precision=lax.Precision.HIGHEST) + b1
        h = jnp.maximum(h, 0.0)
        o = jnp.dot(h, w2r.astype(jnp.float32).T,
                    preferred_element_type=jnp.float32,
                    precision=lax.Precision.HIGHEST) + b2[0]
    return jnp.tanh(o)


def init_params(key, in_channels, width, height):
    """Deterministic synthetic parameters matching Value.__init__ shapes."""
    HW = width * height
    k = jax.random.split(key, 6)
    wc = 0.1 * jax.random.normal(k[0], (in_channels,), jnp.float32)   # conv.weight (1,C,1,1) squeezed
    bc = 0.1 * jax.random.normal(k[1], (1,), jnp.float32)             # conv.bias
    gamma = jnp.ones((1,), jnp.float32)                               # bn.weight (default init)
    beta = jnp.zeros((1,), jnp.float32)                               # bn.bias  (default init)
    w1t = (0.1 * jax.random.normal(k[2], (HW, 128), jnp.float32)
           ).astype(jnp.bfloat16)                                     # ln1.weight.T, bf16 at rest
    b1 = 0.1 * jax.random.normal(k[3], (1, 128), jnp.float32)         # ln1.bias
    w2r = (0.1 * jax.random.normal(k[4], (1, 128), jnp.float32)
           ).astype(jnp.bfloat16)                                     # ln2.weight (1,128), bf16 at rest
    b2 = 0.1 * jax.random.normal(k[5], (1,), jnp.float32)             # ln2.bias
    # Pre-expanded conv weight (built once with the params, not per call):
    # wcx[0, c*HW + l] = wc[c], matching the (B, C*HW) activation layout.
    wcx = jnp.repeat(wc, HW).reshape(1, in_channels * HW)
    return dict(wc=wc, bc=bc, gamma=gamma, beta=beta, wcx=wcx,
                w1t=w1t, b1=b1, w2r=w2r, b2=b2)


if __name__ == "__main__":
    # B multiple of 8 so (B, HW) tiles fill all 8 sublanes.
    B, C, H, W = 8, 4, 16, 16
    key = jax.random.PRNGKey(0)
    kx, kp = jax.random.split(key)
    x = jax.random.normal(kx, (B, C, H, W), jnp.float32)
    params = init_params(kp, C, W, H)

    fwd = jax.jit(value_forward)
    out = jax.block_until_ready(fwd(x, params))
    ref = jax.block_until_ready(value_forward_ref(x, params))                       # bf16-MXU-matched
    ref32 = jax.block_until_ready(value_forward_ref(x, params, bf16_matmul=False))  # full-f32 sanity

    assert out.shape == (B, 1), out.shape
    assert bool(jnp.all(jnp.isfinite(out)))
    assert jnp.allclose(out, ref, atol=2e-3, rtol=2e-3), (out, ref)
    assert jnp.allclose(out, ref32, atol=5e-2, rtol=5e-2), (out, ref32)
    print("KERNEL_OK")
</pallas_src>

<mosaic_0001>
module attributes {stable_mosaic.version = 11 : i64} {
  func.func @value_kernel(%arg0: memref<8x1024xf32, #tpu.memory_space<vmem>>, %arg1: memref<1x1024xf32, #tpu.memory_space<vmem>>, %arg2: memref<1xf32, #tpu.memory_space<smem>>, %arg3: memref<1xf32, #tpu.memory_space<smem>>, %arg4: memref<256x128xbf16, #tpu.memory_space<vmem>>, %arg5: memref<1x128xf32, #tpu.memory_space<vmem>>, %arg6: memref<1x128xbf16, #tpu.memory_space<vmem>>, %arg7: memref<1xf32, #tpu.memory_space<smem>>, %arg8: memref<1x8xf32, #tpu.memory_space<vmem>>) attributes {dimension_semantics = [], scalar_prefetch = 0 : i64, scratch_operands = 0 : i64, tpu.core_type = #tpu.core_type<tc>} {
    %c0 = arith.constant 0 : index
    %c0_0 = arith.constant 0 : index
    %0 = vector.load %arg0[%c0, %c0_0] : memref<8x1024xf32, #tpu.memory_space<vmem>>, vector<8x1024xf32>
    %c0_1 = arith.constant 0 : index
    %c0_2 = arith.constant 0 : index
    %1 = vector.load %arg1[%c0_1, %c0_2] : memref<1x1024xf32, #tpu.memory_space<vmem>>, vector<1x1024xf32>
    %2 = vector.broadcast %1 : vector<1x1024xf32> to vector<8x1024xf32>
    %3 = arith.mulf %0, %2 : vector<8x1024xf32>
    %4 = vector.extract_strided_slice %3 {offsets = [0, 0], sizes = [8, 256], strides = [1, 1]} : vector<8x1024xf32> to vector<8x256xf32>
    %5 = vector.extract_strided_slice %3 {offsets = [0, 256], sizes = [8, 256], strides = [1, 1]} : vector<8x1024xf32> to vector<8x256xf32>
    %6 = arith.addf %4, %5 : vector<8x256xf32>
    %7 = vector.extract_strided_slice %3 {offsets = [0, 512], sizes = [8, 256], strides = [1, 1]} : vector<8x1024xf32> to vector<8x256xf32>
    %8 = arith.addf %6, %7 : vector<8x256xf32>
    %9 = vector.extract_strided_slice %3 {offsets = [0, 768], sizes = [8, 256], strides = [1, 1]} : vector<8x1024xf32> to vector<8x256xf32>
    %10 = arith.addf %8, %9 : vector<8x256xf32>
    %11 = vector.shape_cast %10 : vector<8x256xf32> to vector<1x8x256xf32>
    %cst = arith.constant dense<0.000000e+00> : vector<1xf32>
    %12 = vector.multi_reduction <add>, %11, %cst [1, 2] : vector<1x8x256xf32> to vector<1xf32>
    %13 = vector.shape_cast %12 : vector<1xf32> to vector<1x1x1xf32>
    %14 = vector.extract %13[0, 0, 0] : f32 from vector<1x1x1xf32>
    %15 = arith.mulf %10, %10 : vector<8x256xf32>
    %16 = vector.shape_cast %15 : vector<8x256xf32> to vector<1x8x256xf32>
    %cst_3 = arith.constant dense<0.000000e+00> : vector<1xf32>
    %17 = vector.multi_reduction <add>, %16, %cst_3 [1, 2] : vector<1x8x256xf32> to vector<1xf32>
    %18 = vector.shape_cast %17 : vector<1xf32> to vector<1x1x1xf32>
    %19 = vector.extract %18[0, 0, 0] : f32 from vector<1x1x1xf32>
    %cst_4 = arith.constant 2.048000e+03 : f32
    %20 = arith.divf %14, %cst_4 : f32
    %cst_5 = arith.constant 2.048000e+03 : f32
    %21 = arith.divf %19, %cst_5 : f32
    %22 = arith.mulf %20, %20 : f32
    %23 = arith.subf %21, %22 : f32
    %cst_6 = arith.constant 0.000000e+00 : f32
    %24 = arith.maximumf %23, %cst_6 : f32
    %c0_7 = arith.constant 0 : index
    %25 = memref.load %arg2[%c0_7] : memref<1xf32, #tpu.memory_space<smem>>
    %cst_8 = arith.constant 9.99999974E-6 : f32
    %26 = arith.addf %24, %cst_8 : f32
    %27 = math.rsqrt %26 : f32
    %28 = arith.mulf %25, %27 : f32
    %c0_9 = arith.constant 0 : index
    %29 = memref.load %arg3[%c0_9] : memref<1xf32, #tpu.memory_space<smem>>
    %30 = arith.mulf %20, %28 : f32
    %31 = arith.subf %29, %30 : f32
    %32 = vector.broadcast %28 : f32 to vector<8x256xf32>
    %33 = arith.mulf %10, %32 : vector<8x256xf32>
    %34 = vector.broadcast %31 : f32 to vector<8x256xf32>
    %35 = arith.addf %33, %34 : vector<8x256xf32>
    %cst_10 = arith.constant 0.000000e+00 : f32
    %36 = vector.broadcast %cst_10 : f32 to vector<8x256xf32>
    %37 = arith.maximumf %35, %36 : vector<8x256xf32>
    %38 = arith.truncf %37 : vector<8x256xf32> to vector<8x256xbf16>
    %c0_11 = arith.constant 0 : index
    %c0_12 = arith.constant 0 : index
    %39 = vector.load %arg4[%c0_11, %c0_12] : memref<256x128xbf16, #tpu.memory_space<vmem>>, vector<256x128xbf16>
    %cst_13 = arith.constant dense<0.000000e+00> : vector<8x128xf32>
    %40 = tpu.matmul %38, %39, %cst_13 {dimension_numbers = #tpu.dot_dimension_numbers<[1], [0], [0], [1], [0, 0, 1, 1], [], []>} : vector<8x256xbf16>, vector<256x128xbf16>, vector<8x128xf32> -> vector<8x128xf32>
    %c0_14 = arith.constant 0 : index
    %c0_15 = arith.constant 0 : index
    %41 = vector.load %arg5[%c0_14, %c0_15] : memref<1x128xf32, #tpu.memory_space<vmem>>, vector<1x128xf32>
    %42 = vector.broadcast %41 : vector<1x128xf32> to vector<8x128xf32>
    %43 = arith.addf %40, %42 : vector<8x128xf32>
    %cst_16 = arith.constant 0.000000e+00 : f32
    %44 = vector.broadcast %cst_16 : f32 to vector<8x128xf32>
    %45 = arith.maximumf %43, %44 : vector<8x128xf32>
    %c0_17 = arith.constant 0 : index
    %c0_18 = arith.constant 0 : index
    %46 = vector.load %arg6[%c0_17, %c0_18] : memref<1x128xbf16, #tpu.memory_space<vmem>>, vector<1x128xbf16>
    %47 = arith.truncf %45 : vector<8x128xf32> to vector<8x128xbf16>
    "tpu.trace_start"() <{level = 10 : i32, message = "od,bd->ob"}> : () -> ()
    %cst_19 = arith.constant dense<0.000000e+00> : vector<1x8xf32>
    %48 = tpu.matmul %46, %47, %cst_19 {dimension_numbers = #tpu.dot_dimension_numbers<[1], [1], [0], [0], [0, 0, 1, 0], [], []>} : vector<1x128xbf16>, vector<8x128xbf16>, vector<1x8xf32> -> vector<1x8xf32>
    "tpu.trace_stop"() : () -> ()
    %c0_20 = arith.constant 0 : index
    %49 = memref.load %arg7[%c0_20] : memref<1xf32, #tpu.memory_space<smem>>
    %50 = vector.broadcast %49 : f32 to vector<1x8xf32>
    %51 = arith.addf %48, %50 : vector<1x8xf32>
    %52 = math.tanh %51 : vector<1x8xf32>
    %c0_21 = arith.constant 0 : index
    %c0_22 = arith.constant 0 : index
    %53 = vector.load %arg8[%c0_21, %c0_22] : memref<1x8xf32, #tpu.memory_space<vmem>>, vector<1x8xf32>
    tpu.vector_store %arg8[%c0_21, %c0_22], %52 {strides = array<i32>} : memref<1x8xf32, #tpu.memory_space<vmem>>, vector<1x8xf32>,
    return
  }
}

</mosaic_0001>

<bundles_post_ra>
// kernel: value_forward.1
= control target key start
LH: loop header
LB: loop body
LE: loop exit
PB: predicated region body
PF: predicated region fallthrough
CT: control target
= control target key end

     0   :  { %v44_v0 = vlaneseq  ;;  %s638_s0 = inlined_call_operand.vmem [shape: f32[8,1024], index: 0, kind: input, shape index: {}]   ;;  %s639_s1 = inlined_call_operand.vmem [shape: f32[1,1024], index: 1, kind: input, shape index: {}]   ;;  %s640_s2 = inlined_call_operand.<no memory space> [shape: f32[1], index: 2, kind: input, shape index: {}]   ;;  %s641_s3 = inlined_call_operand.<no memory space> [shape: f32[1], index: 3, kind: input, shape index: {}]   ;;  %s642_s4 = inlined_call_operand.vmem [shape: bf16[256,128], index: 4, kind: input, shape index: {}]   ;;  %s643_s5 = inlined_call_operand.vmem [shape: f32[1,128], index: 5, kind: input, shape index: {}]   ;;  %s644_s6 = inlined_call_operand.vmem [shape: bf16[1,128], index: 6, kind: input, shape index: {}]   ;;  %s645_s7 = inlined_call_operand.<no memory space> [shape: f32[1], index: 7, kind: input, shape index: {}]   ;;  %s646_s8 = inlined_call_operand.hbm [shape: f32[1,8], index: 8, kind: output, shape index: {}]  }
   0x1   :  { %v42_v1 = vld [vmem:[%s639_s1] sm:$0xff]  ;;  %v35_v4 = vld [vmem:[%s638_s0 + $0x8] sm:$0xff]  ;;  %v36_v5 = vld [vmem:[%s638_s0 + $0x10] sm:$0xff] }
   0x2   :  { %v45_v2 = vshrl.u32 %v44_v0, 7  ;;  %v34_v3 = vld [vmem:[%s638_s0] sm:$0xff]  ;;  %v37_v6 = vld [vmem:[%s638_s0 + $0x18] sm:$0xff]  ;;  %v39_v8 = vld [vmem:[%s638_s0 + $0x28] sm:$0xff] }
   0x3   :  { %v38_v7 = vld [vmem:[%s638_s0 + $0x20] sm:$0xff]  ;;  %v40_v13 = vld [vmem:[%s638_s0 + $0x30] sm:$0xff]  ;;  %v41_v14 = vld [vmem:[%s638_s0 + $0x38] sm:$0xff] }
   0x4   :  { %v46_v9 = vsub.s32 0, %v45_v2  ;;  %v50_v10 = vsub.s32 1, %v45_v2  ;;  %v54_v11 = vsub.s32 2, %v45_v2  ;;  %v58_v12 = vsub.s32 3, %v45_v2 }
   0x5   :  { %v62_v15 = vsub.s32 4, %v45_v2  ;;  %v66_v16 = vsub.s32 5, %v45_v2  ;;  %v70_v17 = vsub.s32 6, %v45_v2  ;;  %v74_v18 = vsub.s32 7, %v45_v2 }
   0x6   :  { %v47_v19 = vrot.slane %v42_v1, %v46_v9  ;;  %v51_v20 = vrot.slane %v42_v1, %v50_v10  ;;  %v55_v21 = vrot.slane %v42_v1, %v54_v11  ;;  %v59_v22 = vrot.slane %v42_v1, %v58_v12 }
   0x7   :  { %v63_v23 = vrot.slane %v42_v1, %v62_v15  ;;  %v67_v24 = vrot.slane %v42_v1, %v66_v16  ;;  %v71_v25 = vrot.slane %v42_v1, %v70_v17  ;;  %v75_v26 = vrot.slane %v42_v1, %v74_v18 }
   0x8   :  { %v84_v27 = vmul.f32 %v47_v19, %v34_v3  ;;  %v85_v28 = vmul.f32 %v51_v20, %v35_v4  ;;  %v86_v29 = vmul.f32 %v55_v21, %v36_v5  ;;  %v87_v30 = vmul.f32 %v59_v22, %v37_v6 }
   0x9   :  { %v88_v31 = vmul.f32 %v63_v23, %v38_v7  ;;  %v89_v32 = vmul.f32 %v67_v24, %v39_v8  ;;  %v90_v33 = vmul.f32 %v71_v25, %v40_v13  ;;  %v91_v34 = vmul.f32 %v75_v26, %v41_v14 }
   0xa   :  { %v92_v35 = vadd.f32 %v86_v29, %v84_v27  ;;  %v93_v36 = vadd.f32 %v87_v30, %v85_v28 }
   0xc   :  { %v94_v37 = vadd.f32 %v92_v35, %v88_v31  ;;  %v95_v38 = vadd.f32 %v93_v36, %v89_v32 }
   0xe   :  { %v560_v39 = vadd.f32 %v94_v37, %v90_v33  ;;  %v562_v40 = vadd.f32 %v95_v38, %v91_v34 }
   0xf   :  { %16 = vsyncpa [#allocation6], 0  ;;  %v442_v45 = vld [vmem:[%s642_s4 + $0x78] sm:$0xff]   ;;  %v444_v47 = vld [vmem:[%s642_s4 + $0x70] sm:$0xff]   ;;  %s484_s13 = smov 0.0   ;;  %v485_v23 = vmov 0.0   ;;  %v327_v34 = vstv %s645_s7 }
  0x10   :  { %v98_v41 = vadd.f32 %v562_v40, %v560_v39  ;;  %v108_v42 = vmul.f32 %v560_v39, %v560_v39  ;;  %v109_v43 = vmul.f32 %v562_v40, %v562_v40  ;;  %v443_v46 = vld [vmem:[%s642_s4 + $0x38] sm:$0xff]   ;;  %402 = vmatprep.subr.bf16.mxu0 %v442_v45  ;;  %v445_v48 = vld [vmem:[%s642_s4 + $0x30] sm:$0xff]   ;;  %v446_v49 = vld [vmem:[%s642_s4 + $0x68] sm:$0xff]   ;;  %426 = vmatprep.subr.bf16.mxu1 %v485_v23  ;;  %vm486_vm0 = vmmov 0  }
  0x11   :  { %403 = vmatpush3.bf16.msra.mxu0 %v443_v46  ;;  %v447_v50 = vld [vmem:[%s642_s4 + $0x28] sm:$0xff]   ;;  %v448_v51 = vld [vmem:[%s642_s4 + $0x60] sm:$0xff]   ;;  %v450_v53 = vld [vmem:[%s642_s4 + $0x58] sm:$0xff]   ;;  %428 = vmatprep.mubr.msk.bf16.mxu1 %vm486_vm0, %v485_v23  ;;  %vm369_vm1 = vcmask 57344  }
  0x12   :  { %99 = vadd.xlane.f32.xlu0 %v98_v41  ;;  %v110_v44 = vadd.f32 %v109_v43, %v108_v42  ;;  %404 = vmatprep.subr.bf16.mxu0 %v444_v47  ;;  %v449_v52 = vld [vmem:[%s642_s4 + $0x20] sm:$0xff]   ;;  %v451_v62 = vld [vmem:[%s642_s4 + $0x18] sm:$0xff]   ;;  %v452_v3 = vld [vmem:[%s642_s4 + $0x50] sm:$0xff]  }
  0x13   :  { %v453_v4 = vld [vmem:[%s642_s4 + $0x10] sm:$0xff]   ;;  %v454_v7 = vld [vmem:[%s642_s4 + $0x48] sm:$0xff]   ;;  %v456_v9 = vld [vmem:[%s642_s4 + $0x40] sm:$0xff]  }
  0x14   :  { %v455_v8 = vld [vmem:[%s642_s4 + $0x8] sm:$0xff]   ;;  %v457_v10 = vld [vmem:[%s642_s4] sm:$0xff]  }
  0x15   :  { %405 = vmatpush3.bf16.msra.mxu0 %v445_v48  ;;  %v385_v26 = vld [vmem:[%s643_s5] ss:$0 sm:$0xff]  ;;  %s487_s5 = smov [#allocation5]  }
  0x16   :  { %111 = vadd.xlane.f32.xlu0 %v110_v44  ;;  %406 = vmatprep.subr.bf16.mxu0 %v446_v49  ;;  %v324_v33 = vld [vmem:[%s644_s6] sm:$0x1]  ;;  %s377_s25 = sshll.u32 %s487_s5, 4  ;;  %s378_s25 = int_to_ptr.vmem [resolvable:$true] %s377_s25 }
  0x17   :  { %s462_s26 = scalar_lea.vmem %s378_s25, 16  ;;  %s466_s6 = scalar_lea.vmem %s378_s25, 32 }
  0x18   :  { %p463_p0 = scmp.ne.s32.totalorder %s378_s25, %s462_s26  ;;  %p467_p1 = scmp.lt.s32.totalorder %s378_s25, %s378_s25 }
  0x19   :  { %407 = vmatpush3.bf16.msra.mxu0 %v447_v50  ;;  %p468_p2 = scmp.lt.s32.totalorder %s466_s6, %s462_s26 }
  0x1a   :  { %408 = vmatprep.subr.bf16.mxu0 %v448_v51 }
  0x1b   :  { %p469_p3 = por %p468_p2, %p467_p1 }
  0x1d   :  { %409 = vmatpush3.bf16.msra.mxu0 %v449_v52  ;;  %p470_p4 = pnand %p469_p3, %p463_p0 }
  0x1e   :  { %410 = vmatprep.subr.bf16.mxu0 %v450_v53 }
  0x21   :  { %411 = vmatpush3.bf16.msra.mxu0 %v451_v62 }
  0x22   :  { %412 = vmatprep.subr.bf16.mxu0 %v452_v3 }
  0x25   :  { %413 = vmatpush3.bf16.msra.mxu0 %v453_v4 }
  0x26   :  { %414 = vmatprep.subr.bf16.mxu0 %v454_v7 }
  0x29   :  { %415 = vmatpush3.bf16.msra.mxu0 %v455_v8 }
  0x2a   :  { %416 = vmatprep.subr.bf16.mxu0 %v456_v9 }
  0x2d   :  { %417 = vmatpush3.bf16.msra.mxu0 %v457_v10 }
  0x9b   :  { %v100_v54 = vpop.xlane.xlu0 %99 }
  0x9c   :  { %v101_v55 = vrot.slane %v100_v54, 4 }
  0x9e   :  { %v102_v56 = vadd.f32 %v101_v55, %v100_v54 }
  0x9f   :  { %v112_v57 = vpop.xlane.xlu0 %111 }
  0xa0   :  { %v103_v58 = vrot.slane %v102_v56, 2  ;;  %v113_v59 = vrot.slane %v112_v57, 4 }
  0xa2   :  { %v114_v60 = vadd.f32 %v113_v59, %v112_v57  ;;  %v104_v61 = vadd.f32 %v103_v58, %v102_v56 }
  0xa4   :  { %v115_v63 = vrot.slane %v114_v60, 2  ;;  %v105_v0 = vrot.slane %v104_v61, 1 }
  0xa6   :  { %v116_v1 = vadd.f32 %v115_v63, %v114_v60  ;;  %v106_v2 = vadd.f32 %v105_v0, %v104_v61 }
  0xa8   :  { %432 = vpush %v106_v2  ;;  %v117_v5 = vrot.slane %v116_v1, 1 }
  0xaa   :  { %v118_v6 = vadd.f32 %v117_v5, %v116_v1 }
  0xac   :  { %434 = vpush %v118_v6 }
  0xd9   :  { %s433_s29 = spop %432 }
  0xda   :  { %s122_s30 = smul.f32 0.00048828125, %s433_s29 }
  0xdc   :  { %s126_s9 = smul.f32 %s122_s30, %s122_s30 }
  0xdd   :  { %s435_s10 = spop %434 }
  0xde   :  { %s125_s11 = smul.f32 0.00048828125, %s435_s10 }
  0xe0   :  { %s127_s12 = ssub.f32 %s125_s11, %s126_s9 }
  0xe2   :  { %s128_s14 = smax.f32 %s484_s13, %s127_s12 }
  0xe3   :  { %s130_s15 = sadd.f32 1e-05, %s128_s14 }
  0xe5   :  { %v131_v11 = vstv %s130_s15 }
  0xe6   :  { %458 = vrsqrt.f32 %v131_v11 }
  0xf3   :  { %v459_v12 = vpop.eup %458 }
  0xf4   :  { %436 = vpush %v459_v12 }
 0x125   :  { %s437_s16 = spop %436 }
 0x126   :  { %s134_s4 = smul.f32 %s437_s16, %s640_s2 }
 0x128   :  { %s136_s18 = smul.f32 %s134_s4, %s122_s30  ;;  %v138_v13 = vstv %s134_s4 }
 0x129   :  { %v139_v14 = vmul.f32 %v138_v13, %v560_v39  ;;  %v140_v15 = vmul.f32 %v138_v13, %v562_v40 }
 0x12a   :  { %s137_s21 = ssub.f32 %s641_s3, %s136_s18 }
 0x12c   :  { %v141_v16 = vstv %s137_s21 }
 0x12d   :  { %v142_v17 = vadd.f32 %v141_v16, %v139_v14  ;;  %v143_v18 = vadd.f32 %v141_v16, %v140_v15 }
 0x12f   :  { %v144_v19 = vmax.f32 %v142_v17, 0.0  ;;  %v145_v20 = vmax.f32 %v143_v18, 0.0 }
 0x131   :  { %v147_v21 = vpack.c.bf16 %v145_v20, %v145_v20  ;;  %v146_v22 = vpack.c.bf16 %v144_v19, %v144_v19 }
 0x133   :  { %315 = vmatprep.mubr.bf16.mxu0 %v147_v21 }
 0x134   :  { %316 = vmatmul.mubr.bf16.vlgmr.msra.gmra.mxu0 %v146_v22 }
 0x1f4   :  { %v418_v24 = vpop.f32.mrf.mxu0 }
 0x1f6   :  { %v419_v25 = vpop.f32.mrf.mxu0 }
 0x1f7   :  { %v420_v27 = vadd.f32 %v419_v25, %v418_v24 }
 0x1f8   :  { %v421_v28 = vpop.f32.mrf.mxu0 }
 0x1f9   :  { %v318_v29 = vadd.f32 %v420_v27, %v385_v26 }
 0x1fa   :  { %v422_v30 = vpop.f32.mrf.mxu0 }
 0x1fb   :  { %v323_v31 = vmax.f32 %v318_v29, 0.0 }
 0x1fd   :  { %v325_v32 = vpack.c.bf16 %v323_v31, %v323_v31 }
 0x1ff   :  { %427 = vmatpush3.bf16.xpose.msra.mxu1 %v325_v32 }
 0x206   :  { %429 = vmatmul.mubr.bf16.vlgmr.msra.gmra.mxu1 %v324_v33 }
 0x2c6   :  { %v362_v35 = vpop.f32.mrf.mxu1 }
 0x2c7   :  { %v363_v36 = vadd.f32 %v362_v35, %v327_v34 }
 0x2c8   :  { %v430_v37 = vpop.f32.mrf.mxu1 }
 0x2c9   :  { %460 = vtanh.f32 %v363_v36 }
 0x2ca   :  { %v365_v38 = vpop.f32.mrf.mxu1 }
 0x2cc   :  { %v431_v39 = vpop.f32.mrf.mxu1 }
 0x2d6   :  { %v461_v40 = vpop.eup %460 }
 0x2d7   :  { %370 = vst.msk [vmem:[#allocation5] sm:$0x1] %vm369_vm1, %v461_v40 }
 0x2d8   :  { %473 = shalt.err (!%p470_p4)
}
 0x2d9   :  { %380 = dma.vmem_to_hbm [thread:$0]  %s378_s25, 16, %s646_s8, [#allocation6]  }
 0x2da   :  { %482 = dma.done.wait [#allocation6], 16  }
 0x2db   :  { %483 = vsyncadd [#allocation6], 4294967280 }
 0x2dc   :  { %384 = vsyncpa [#allocation6], 1 }

</bundles_post_ra>
